<compile_context>
chip_gen: v5e
topology: v5e:2x2
jax: 0.10.0
libtpu: 0.0.40
codegen_flags: <defaults>
</compile_context>

<pallas_src>
import functools

import jax
import jax.numpy as jnp
from jax.experimental import pallas as pl
from jax.experimental.pallas import tpu as pltpu

IN_PAD = 16                 # input_size(11) zero-padded to a sublane multiple
H_PAD = 128                 # hidden(32) + 1 constant-1 unit, padded to full lane width
O_PAD = 8                   # output(3) padded to only 8 lanes (narrow writeback)
B1_ROW = IN_PAD             # packed-buffer row holding the augmented first-layer bias
W2_ROW = IN_PAD + 8         # 8-aligned start row of the second-layer weights
P_ROWS = W2_ROW + H_PAD     # total rows of the packed parameter buffer (152)
TILE_B = 2048               # batch tile for the gridded (very-large-batch) path
_SINGLE_CALL_MAX_B = 4096   # at or below this padded batch, run grid-free in VMEM


def _qnet_kernel(x_ref, p_ref, out_ref):
    """Fused  relu(x @ W1 + b1) @ W2a  on lane-dense, zero-padded operands.

    p_ref packs all parameters into one (P_ROWS, 128) buffer (single DMA):
      rows [0, IN_PAD)              -> W1 zero-padded to (IN_PAD, H_PAD)
      row  B1_ROW                   -> b1 augmented with 1.0 at column `hidden`
      rows [W2_ROW, W2_ROW + H_PAD) -> W2a (b2 folded into row `hidden`);
                                       only lanes [0, O_PAD) are meaningful.
    The constant-1 hidden unit (relu(0 + 1) == 1) picks up b2 from W2a.
    """
    x = x_ref[...]                                   # (Bt, IN_PAD)
    w1 = p_ref[0:IN_PAD, :]                          # (IN_PAD, H_PAD)
    b1 = p_ref[B1_ROW:B1_ROW + 1, :]                 # (1, H_PAD) broadcast row
    w2 = p_ref[W2_ROW:W2_ROW + H_PAD, 0:O_PAD]       # (H_PAD, O_PAD) narrow slice

    h = jnp.dot(x, w1, preferred_element_type=jnp.float32) + b1   # bias: 1 VPU add
    h = jnp.maximum(h, 0.0)                                        # ReLU
    o = jnp.dot(h, w2, preferred_element_type=jnp.float32)
    out_ref[...] = o.astype(out_ref.dtype)           # narrow (Bt, 8) store


def pack_params(w1, b1, w2, b2):
    """Pack zero-padded W1, augmented b1, and b2-folded W2 into one f32 buffer.

    w1: (In, H), b1: (H,), w2: (H, O), b2: (O,)   (x @ W layout, i.e. torch W.T).
    Returns a (P_ROWS, H_PAD) float32 buffer.
    """
    In, H = w1.shape
    O = w2.shape[1]
    assert In <= IN_PAD and H + 1 <= H_PAD and O <= O_PAD

    p = jnp.zeros((P_ROWS, H_PAD), jnp.float32)
    p = p.at[:In, :H].set(w1.astype(jnp.float32))                  # W1
    p = p.at[B1_ROW, :H].set(b1.astype(jnp.float32))               # b1
    p = p.at[B1_ROW, H].set(1.0)                                   # constant-1 hidden unit
    p = p.at[W2_ROW:W2_ROW + H, :O].set(w2.astype(jnp.float32))    # W2
    p = p.at[W2_ROW + H, :O].set(b2.astype(jnp.float32))           # b2 (via unit H)
    return p


@functools.partial(jax.jit, static_argnames=("input_size", "output_size"))
def linear_qnet_forward(x, packed_params, *, input_size, output_size):
    """x: (B, input_size); packed_params: (P_ROWS, H_PAD). Returns (B, output_size)."""
    B = x.shape[0]

    # Pad batch to a sublane multiple (>=8); for the gridded path, to TILE_B.
    B_pad = max(8, -(-B // 8) * 8)
    use_grid = B_pad > _SINGLE_CALL_MAX_B
    if use_grid:
        B_pad = -(-B // TILE_B) * TILE_B

    # One fused pad: batch rows up to B_pad, features up to IN_PAD.
    x_pad = jnp.pad(x.astype(jnp.float32),
                    ((0, B_pad - B), (0, IN_PAD - input_size)))

    if not use_grid:
        # Small/typical batch: no grid, no pipeline scaffolding, all resident in VMEM.
        out = pl.pallas_call(
            _qnet_kernel,
            out_shape=jax.ShapeDtypeStruct((B_pad, O_PAD), jnp.float32),
            in_specs=[
                pl.BlockSpec(memory_space=pltpu.MemorySpace.VMEM),
                pl.BlockSpec(memory_space=pltpu.MemorySpace.VMEM),
            ],
            out_specs=pl.BlockSpec(memory_space=pltpu.MemorySpace.VMEM),
        )(x_pad, packed_params)
    else:
        # Very large (replay-buffer style) batch: tile B; the packed-params block
        # index is constant, so the weights stay resident across the grid.  The
        # "parallel" axis lets v7x's two TensorCores split the batch.
        out = pl.pallas_call(
            _qnet_kernel,
            out_shape=jax.ShapeDtypeStruct((B_pad, O_PAD), jnp.float32),
            grid=(B_pad // TILE_B,),
            in_specs=[
                pl.BlockSpec((TILE_B, IN_PAD), lambda i: (i, 0)),
                pl.BlockSpec((P_ROWS, H_PAD), lambda i: (0, 0)),
            ],
            out_specs=pl.BlockSpec((TILE_B, O_PAD), lambda i: (i, 0)),
            compiler_params=pltpu.CompilerParams(
                dimension_semantics=("parallel",),
            ),
        )(x_pad, packed_params)

    return out[:B, :output_size]


def init_params(key, input_size, hidden_size, output_size):
    """Deterministic init mimicking torch.nn.Linear (uniform +/- 1/sqrt(fan_in))."""
    k1, k2, k3, k4 = jax.random.split(key, 4)
    lim1 = 1.0 / jnp.sqrt(jnp.float32(input_size))
    lim2 = 1.0 / jnp.sqrt(jnp.float32(hidden_size))
    # Stored directly as (in_features, out_features) = W.T relative to PyTorch.
    w1 = jax.random.uniform(k1, (input_size, hidden_size), jnp.float32, -lim1, lim1)
    b1 = jax.random.uniform(k2, (hidden_size,), jnp.float32, -lim1, lim1)
    w2 = jax.random.uniform(k3, (hidden_size, output_size), jnp.float32, -lim2, lim2)
    b2 = jax.random.uniform(k4, (output_size,), jnp.float32, -lim2, lim2)
    return w1, b1, w2, b2


if __name__ == "__main__":
    # Small shapes consistent with the snake-AI use of LinearQNet.
    batch = 2
    input_size = 11
    hidden_size = 32
    output_size = 3

    key = jax.random.PRNGKey(0)
    kx, kp, kb = jax.random.split(key, 3)
    x = jax.random.normal(kx, (batch, input_size), jnp.float32)
    w1, b1, w2, b2 = init_params(kp, input_size, hidden_size, output_size)
    params = pack_params(w1, b1, w2, b2)

    # --- single-state (inference-style) path: grid-free kernel ---
    out = linear_qnet_forward(x, params, input_size=input_size, output_size=output_size)
    out = jax.block_until_ready(out)
    ref = jnp.maximum(x @ w1 + b1, 0.0) @ w2 + b2
    assert out.shape == (batch, output_size)
    assert jnp.allclose(out, ref, atol=1e-5, rtol=1e-5)

    # --- very large batch path: B-tiled parallel grid (both TCs on v7x) ---
    big_batch = 8192
    xb = jax.random.normal(kb, (big_batch, input_size), jnp.float32)
    outb = linear_qnet_forward(xb, params, input_size=input_size, output_size=output_size)
    outb = jax.block_until_ready(outb)
    refb = jnp.maximum(xb @ w1 + b1, 0.0) @ w2 + b2
    assert outb.shape == (big_batch, output_size)
    assert jnp.allclose(outb, refb, atol=1e-4, rtol=1e-4)

    print("KERNEL_OK")
</pallas_src>

<mosaic_0001>
module attributes {stable_mosaic.version = 11 : i64} {
  func.func @_qnet_kernel(%arg0: memref<8x16xf32, #tpu.memory_space<vmem>>, %arg1: memref<152x128xf32, #tpu.memory_space<vmem>>, %arg2: memref<8x8xf32, #tpu.memory_space<vmem>>) attributes {dimension_semantics = [], scalar_prefetch = 0 : i64, scratch_operands = 0 : i64, tpu.core_type = #tpu.core_type<tc>} {
    %c0 = arith.constant 0 : index
    %c0_0 = arith.constant 0 : index
    %0 = vector.load %arg0[%c0, %c0_0] : memref<8x16xf32, #tpu.memory_space<vmem>>, vector<8x16xf32>
    %c0_1 = arith.constant 0 : index
    %c0_2 = arith.constant 0 : index
    %1 = vector.load %arg1[%c0_1, %c0_2] : memref<152x128xf32, #tpu.memory_space<vmem>>, vector<16x128xf32>
    %c16 = arith.constant 16 : index
    %c0_3 = arith.constant 0 : index
    %2 = vector.load %arg1[%c16, %c0_3] : memref<152x128xf32, #tpu.memory_space<vmem>>, vector<1x128xf32>
    %c24 = arith.constant 24 : index
    %c0_4 = arith.constant 0 : index
    %3 = vector.load %arg1[%c24, %c0_4] : memref<152x128xf32, #tpu.memory_space<vmem>>, vector<128x8xf32>
    %cst = arith.constant dense<0.000000e+00> : vector<8x128xf32>
    %4 = tpu.matmul %0, %1, %cst {dimension_numbers = #tpu.dot_dimension_numbers<[1], [0], [0], [1], [0, 0, 1, 1], [], []>} : vector<8x16xf32>, vector<16x128xf32>, vector<8x128xf32> -> vector<8x128xf32>
    %5 = vector.broadcast %2 : vector<1x128xf32> to vector<8x128xf32>
    %6 = arith.addf %4, %5 : vector<8x128xf32>
    %cst_5 = arith.constant 0.000000e+00 : f32
    %7 = vector.broadcast %cst_5 : f32 to vector<8x128xf32>
    %8 = arith.maximumf %6, %7 : vector<8x128xf32>
    %cst_6 = arith.constant dense<0.000000e+00> : vector<8x8xf32>
    %9 = tpu.matmul %8, %3, %cst_6 {dimension_numbers = #tpu.dot_dimension_numbers<[1], [0], [0], [1], [0, 0, 1, 1], [], []>} : vector<8x128xf32>, vector<128x8xf32>, vector<8x8xf32> -> vector<8x8xf32>
    %c0_7 = arith.constant 0 : index
    %c0_8 = arith.constant 0 : index
    %10 = vector.load %arg2[%c0_7, %c0_8] : memref<8x8xf32, #tpu.memory_space<vmem>>, vector<8x8xf32>
    tpu.vector_store %arg2[%c0_7, %c0_8], %9 {strides = array<i32>} : memref<8x8xf32, #tpu.memory_space<vmem>>, vector<8x8xf32>,
    return
  }
}

</mosaic_0001>

<bundles_post_ra>
// kernel: linear_qnet_forward.1
= control target key start
LH: loop header
LB: loop body
LE: loop exit
PB: predicated region body
PF: predicated region fallthrough
CT: control target
= control target key end

     0   :  { %7 = vsyncpa [#allocation3], 0  ;;  %s131_s12 = smov [#allocation2]   ;;  %s132_s14 = smov 128   ;;  %s158_s0 = inlined_call_operand.vmem [shape: f32[8,16], index: 0, kind: input, shape index: {}]   ;;  %s159_s1 = inlined_call_operand.hbm [shape: f32[152,128], index: 1, kind: input, shape index: {}]   ;;  %s160_s2 = inlined_call_operand.vmem [shape: f32[8,8], index: 2, kind: output, shape index: {}]  }
   0x1   :  { %s14_s11 = sshll.u32 %s159_s1, 4  ;;  %s16_s13 = sshll.u32 %s131_s12, 4  ;;  %s15_s11 = int_to_ptr.hbm [resolvable:$true] %s14_s11  ;;  %s17_s13 = int_to_ptr.vmem [resolvable:$true] %s16_s13 }
   0x2   :  { %s133_s15 = smov 8  }
   0x3   :  { %22 = dma.hbm_to_vmem [thread:$0]  %s15_s11, 2432, %s17_s13, [#allocation3], %s132_s14, %s132_s14, %s133_s15  }
   0x4   :  { %129 = dma.done.wait [#allocation3], 2432  }
   0x5   :  { %130 = vsyncadd [#allocation3], 4294964864  ;;  %v29_v0 = vld [vmem:[#allocation2 + $0x8] sm:$0xff]  ;;  %v28_v1 = vld [vmem:[#allocation2] sm:$0xff]  ;;  %vm48_vm0 = vcmask 130048   ;;  %vm93_vm1 = vcmask 64512  }
   0x6   :  { %66 = vmatpush.msra.mxu0 %v29_v0  ;;  %v27_v2 = vld [vmem:[%s158_s0] sm:$0xff]  ;;  %v46_v3 = vld [vmem:[#allocation2 + $0x90] sm:$0xff]  ;;  %v45_v4 = vld [vmem:[#allocation2 + $0x88] sm:$0xff] }
   0x7   :  { %73 = vmatpush.msra.mxu1 %v46_v3  ;;  %v44_v5 = vld [vmem:[#allocation2 + $0x80] sm:$0xff]  ;;  %v43_v6 = vld [vmem:[#allocation2 + $0x78] sm:$0xff]  ;;  %v42_v7 = vld [vmem:[#allocation2 + $0x70] sm:$0xff] }
   0x8   :  { %67 = vmatpush.msra.mxu0 %v28_v1  ;;  %v41_v8 = vld [vmem:[#allocation2 + $0x68] sm:$0xff]  ;;  %v40_v9 = vld [vmem:[#allocation2 + $0x60] sm:$0xff]  ;;  %v39_v10 = vld [vmem:[#allocation2 + $0x58] sm:$0xff] }
   0x9   :  { %100 = vmatmul.msk.f32.vlgmr.msra.gmra.mxu0 %vm48_vm0, %v27_v2  ;;  %74 = vmatpush.msra.mxu1 %v45_v4  ;;  %v38_v11 = vld [vmem:[#allocation2 + $0x50] sm:$0xff]  ;;  %v37_v12 = vld [vmem:[#allocation2 + $0x48] sm:$0xff]  ;;  %v36_v13 = vld [vmem:[#allocation2 + $0x40] sm:$0xff] }
   0xa   :  { %v35_v14 = vld [vmem:[#allocation2 + $0x38] sm:$0xff]  ;;  %v34_v15 = vld [vmem:[#allocation2 + $0x30] sm:$0xff]  ;;  %v33_v16 = vld [vmem:[#allocation2 + $0x28] sm:$0xff] }
   0xb   :  { %75 = vmatpush.msra.mxu1 %v44_v5  ;;  %v32_v17 = vld [vmem:[#allocation2 + $0x20] sm:$0xff]  ;;  %v31_v18 = vld [vmem:[#allocation2 + $0x18] sm:$0xff]  ;;  %v104_v19 = vld [vmem:[#allocation2 + $0x10] ss:$0 sm:$0xff] }
   0xd   :  { %76 = vmatpush.msra.mxu1 %v43_v6 }
   0xf   :  { %77 = vmatpush.msra.mxu1 %v42_v7 }
  0x11   :  { %78 = vmatpush.msra.mxu1 %v41_v8 }
  0x13   :  { %79 = vmatpush.msra.mxu1 %v40_v9 }
  0x15   :  { %80 = vmatpush.msra.mxu1 %v39_v10 }
  0x17   :  { %81 = vmatpush.msra.mxu1 %v38_v11 }
  0x19   :  { %82 = vmatpush.msra.mxu1 %v37_v12 }
  0x1b   :  { %83 = vmatpush.msra.mxu1 %v36_v13 }
  0x1d   :  { %84 = vmatpush.msra.mxu1 %v35_v14 }
  0x1f   :  { %85 = vmatpush.msra.mxu1 %v34_v15 }
  0x21   :  { %86 = vmatpush.msra.mxu1 %v33_v16 }
  0x23   :  { %87 = vmatpush.msra.mxu1 %v32_v17 }
  0x25   :  { %88 = vmatpush.msra.mxu1 %v31_v18 }
  0x86   :  { %v69_v20 = vpop.f32.mrf.mxu0 }
  0x87   :  { %v70_v21 = vadd.f32 %v104_v19, %v69_v20 }
  0x89   :  { %v72_v22 = vmax.f32 %v70_v21, 0.0 }
  0x8b   :  { %89 = vmatmul.f32.vlgmr.msra.gmra.mxu1 %v72_v22 }
 0x108   :  { %v90_v23 = vpop.f32.mrf.mxu1 }
 0x109   :  { %94 = vst.msk [vmem:[%s160_s2] sm:$0xff] %vm93_vm1, %v90_v23 }
 0x10a   :  { %99 = vsyncpa [#allocation3], 1 }

</bundles_post_ra>
